<compile_context>
chip_gen: v6e
topology: v6e:2x2x1
jax: 0.10.0
libtpu: 0.0.40
codegen_flags: <defaults>
</compile_context>

<pallas_src>
import functools

import jax
import jax.numpy as jnp
from jax.experimental import pallas as pl
from jax.experimental.pallas import tpu as pltpu

_LANE = 128
_MAX_COLS = 8192                      # lane-dense slab width cap
_MAX_BLOCK_BYTES = 8 * 1024 * 1024    # per-block cap -> 4 buffers <= 32 MiB


def _copy_kernel(x_ref, o_ref):
    # Pure data movement: copy the current lane-dense tile.
    o_ref[...] = x_ref[...]


def _pick_lane_dense_cols(total, sub):
    """Largest cols <= _MAX_COLS that is a multiple of 128, divides `total`,
    and leaves rows = total // cols a multiple of the sublane packing `sub`.
    Returns None if no such layout exists."""
    cols = None
    c = _LANE
    cap = min(_MAX_COLS, total)
    while c <= cap:
        if total % c == 0 and (total // c) % sub == 0:
            cols = c
        c += _LANE
    return cols


@functools.partial(jax.jit, static_argnums=(1, 2, 3))
def unflatten(x, channel, height, width):
    """Pallas equivalent of Unflatten(channel, height, width)(x).

    x: (N, channel*height*width) array (flat NCHW order, like torch view input)
    returns: (N, channel, height, width)
    """
    n, flat = x.shape
    if flat != channel * height * width:
        raise ValueError(
            f"input feature dim {flat} != channel*height*width "
            f"{channel * height * width}")

    itemsize = jnp.dtype(x.dtype).itemsize
    sub = 8 * max(1, 4 // itemsize)   # f32: 8, bf16: 16, int8: 32
    total = n * flat

    cols = _pick_lane_dense_cols(total, sub)

    if cols is not None:
        # Lane-dense 2D relayout: (rows, cols) with cols a big multiple of 128
        # and rows a multiple of the packed sublane count.
        rows = total // cols
        row_bytes = cols * itemsize
        max_block_rows = max(sub, (_MAX_BLOCK_BYTES // row_bytes) // sub * sub)
        block_rows = min(rows, max_block_rows)
        while rows % block_rows != 0:   # keep an even grid; terminates at `sub`
            block_rows -= sub
        grid = (rows // block_rows,)

        x2d = x.reshape(rows, cols)     # free bitcast under jit (row-major)
        flat_out = pl.pallas_call(
            _copy_kernel,
            out_shape=jax.ShapeDtypeStruct((rows, cols), x.dtype),
            grid_spec=pl.GridSpec(
                grid=grid,
                in_specs=[pl.BlockSpec((block_rows, cols), lambda i: (i, 0))],
                out_specs=pl.BlockSpec((block_rows, cols), lambda i: (i, 0)),
            ),
            input_output_aliases={0: 0},
            compiler_params=pltpu.CompilerParams(
                dimension_semantics=("parallel",),
                vmem_limit_bytes=48 * 1024 * 1024,
            ),
        )(x2d)
    else:
        # Irregular total size (not divisible into a lane-dense slab): single
        # full-array block (legal: block equals full dims).  Only hit for
        # tiny / odd shapes.
        flat_out = pl.pallas_call(
            _copy_kernel,
            out_shape=jax.ShapeDtypeStruct((n, flat), x.dtype),
            grid_spec=pl.GridSpec(
                grid=(1,),
                in_specs=[pl.BlockSpec((n, flat), lambda i: (0, 0))],
                out_specs=pl.BlockSpec((n, flat), lambda i: (0, 0)),
            ),
            input_output_aliases={0: 0},
        )(x)

    # Metadata-only view to (N, C, H, W), identical to torch .view().
    return flat_out.reshape(n, channel, height, width)


if __name__ == "__main__":
    # Module config: unflatten (N, C*H*W) -> (N, C, H, W).
    N, C, H, W = 2, 4, 16, 16

    key = jax.random.PRNGKey(0)
    x = jax.random.normal(key, (N, C * H * W), dtype=jnp.float32)

    out = unflatten(x, C, H, W)
    out = jax.block_until_ready(out)

    # Reference: plain JAX reshape (== torch .view on a contiguous tensor).
    ref = x.reshape(N, C, H, W)
    assert out.shape == (N, C, H, W), out.shape
    assert out.dtype == x.dtype
    assert jnp.array_equal(out, ref)

    print("KERNEL_OK")
</pallas_src>

<mosaic_0001>
module attributes {stable_mosaic.version = 11 : i64} {
  func.func @_copy_kernel(%arg0: i32, %arg1: memref<8x256xf32, #tpu.memory_space<vmem>>, %arg2: memref<8x256xf32, #tpu.memory_space<vmem>>) attributes {dimension_semantics = [#tpu.dimension_semantics<parallel>], iteration_bounds = array<i64: 1>, scalar_prefetch = 0 : i64, scratch_operands = 0 : i64, tpu.core_type = #tpu.core_type<tc>, window_params = [{transform_indices = @transform_0, window_bounds = array<i64: 8, 256>}, {transform_indices = @transform_1, window_bounds = array<i64: 8, 256>}]} {
    %c0 = arith.constant 0 : index
    %c0_0 = arith.constant 0 : index
    %0 = vector.load %arg1[%c0, %c0_0] : memref<8x256xf32, #tpu.memory_space<vmem>>, vector<8x256xf32>
    %c0_1 = arith.constant 0 : index
    %c0_2 = arith.constant 0 : index
    %1 = vector.load %arg2[%c0_1, %c0_2] : memref<8x256xf32, #tpu.memory_space<vmem>>, vector<8x256xf32>
    tpu.vector_store %arg2[%c0_1, %c0_2], %0 {strides = array<i32>} : memref<8x256xf32, #tpu.memory_space<vmem>>, vector<8x256xf32>,
    return
  }
  func.func @transform_0(%arg0: i32) -> (i32, i32) {
    %c0_i32 = arith.constant 0 : i32
    %c0_i32_0 = arith.constant 0 : i32
    return %arg0, %c0_i32 : i32, i32
  }
  func.func @transform_1(%arg0: i32) -> (i32, i32) {
    %c0_i32 = arith.constant 0 : i32
    %c0_i32_0 = arith.constant 0 : i32
    return %arg0, %c0_i32 : i32, i32
  }
}

</mosaic_0001>

<bundles_post_ra>
// kernel: unflatten.1
= control target key start
LH: loop header
LB: loop body
LE: loop exit
PB: predicated region body
PF: predicated region fallthrough
CT: control target
= control target key end

     0   :  { %s38_s0 = inlined_call_operand.vmem [shape: f32[8,256], index: 0, kind: input, shape index: {}, may-alias: {0,1}]   ;;  %s39_s1 = inlined_call_operand.vmem [shape: f32[8,256], index: 1, kind: output, shape index: {}, may-alias: {0,1}]  }
   0x1   :  { %v8_v0 = vld [vmem:[%s38_s0] sm:$0xff]  ;;  %v9_v1 = vld [vmem:[%s38_s0 + $0x8] sm:$0xff] }
   0x2   :  { %10 = vst [vmem:[%s39_s1] sm:$0xff] %v8_v0  ;;  %11 = vst [vmem:[%s39_s1 + $0x8] sm:$0xff] %v9_v1 }

</bundles_post_ra>
